<compile_context>
chip_gen: v6e
topology: v6e:2x2x1
jax: 0.10.0
libtpu: 0.0.40
codegen_flags: <defaults>
</compile_context>

<pallas_src>
import jax
import jax.numpy as jnp
from jax.experimental import pallas as pl
from jax.experimental.pallas import tpu as pltpu

# Per-block VMEM budget. With input + output each double-buffered this is ~4x in
# flight (~8 MiB), comfortably under the scoped-VMEM default on v5e/v6e/v7x.
_BLOCK_BUDGET_BYTES = 2 * 1024 * 1024


def _make_rsoftmax_kernel(radix: int, cardinality: int):
    def kernel(x_ref, o_ref):
        # x_ref: (Bt, cardinality*radix, Rt)  rows ordered (c, r)  [input layout]
        # o_ref: (Bt, radix*cardinality, Rt)  rows ordered (r, c)  [output layout]
        # Softmax over radix within each cardinality group; writing input row
        # c*radix + r to output row r*cardinality + c fuses the transpose into
        # the store index (no XLA transpose pass, no in-kernel relayout ops).
        for c in range(cardinality):  # static unroll; radix/cardinality are small
            rows = [x_ref[:, c * radix + r, :].astype(jnp.float32)
                    for r in range(radix)]
            m = rows[0]
            for r in range(1, radix):
                m = jnp.maximum(m, rows[r])
            exps = [jnp.exp(row - m) for row in rows]
            s = exps[0]
            for e in exps[1:]:
                s = s + e
            inv = 1.0 / s  # exact divide: rows sum to 1 to full f32 precision
            for r in range(radix):
                o_ref[:, r * cardinality + c, :] = (exps[r] * inv).astype(o_ref.dtype)

    return kernel


def _sigmoid_kernel(x_ref, o_ref):
    x = x_ref[...].astype(jnp.float32)
    o_ref[...] = (1.0 / (1.0 + jnp.exp(-x))).astype(o_ref.dtype)


def _pick_tiles_softmax(batch, rest, group, item_bytes):
    """Tile (B, group, rest): full rows when they fit, else lane tiles of 128*k."""
    row_bytes = group * rest * item_bytes
    if row_bytes <= _BLOCK_BUDGET_BYTES:
        rt = rest                                           # full last dim (legal)
        bt = max(1, min(batch, _BLOCK_BUDGET_BYTES // row_bytes))
    else:
        bt = 1
        rt = (_BLOCK_BUDGET_BYTES // (group * item_bytes)) // 128 * 128
        rt = max(128, rt)                                   # multiple of 128 (legal)
        rt = min(rt, rest)
    return bt, rt


def _pick_tiles_sigmoid(batch, per_batch, item_bytes):
    """Tile (B, per_batch) in 2D so huge feature maps never blow scoped VMEM."""
    bt = batch if batch <= 8 else 8                         # full or multiple of 8
    if bt * per_batch * item_bytes <= _BLOCK_BUDGET_BYTES:
        lt = per_batch                                      # full last dim (legal)
    else:
        lt = (_BLOCK_BUDGET_BYTES // (bt * item_bytes)) // 128 * 128
        lt = max(128, min(lt, per_batch))                   # multiple of 128 (legal)
    return bt, lt


def rsoftmax(x, radix: int, cardinality: int):
    """JAX/Pallas equivalent of rSoftMax.forward. x is NCHW-like (B, ...)."""
    batch = x.shape[0]
    per_batch = 1
    for d in x.shape[1:]:
        per_batch *= d
    item_bytes = jnp.dtype(x.dtype).itemsize

    if radix > 1:
        if per_batch % (cardinality * radix) != 0:
            raise ValueError(
                f"rSoftMax: features per batch ({per_batch}) must be divisible "
                f"by cardinality*radix ({cardinality * radix}).")
        rest = per_batch // (cardinality * radix)
        group = cardinality * radix

        # Free reshape: rows ordered (cardinality, radix), exactly as in memory.
        x3 = x.reshape(batch, group, rest)

        bt, rt = _pick_tiles_softmax(batch, rest, group, item_bytes)
        grid = (pl.cdiv(batch, bt), pl.cdiv(rest, rt))
        n = batch * group * rest

        out3 = pl.pallas_call(
            _make_rsoftmax_kernel(radix, cardinality),
            out_shape=jax.ShapeDtypeStruct((batch, group, rest), x.dtype),
            grid=grid,
            in_specs=[pl.BlockSpec((bt, group, rt), lambda b, j: (b, 0, j))],
            out_specs=pl.BlockSpec((bt, group, rt), lambda b, j: (b, 0, j)),
            compiler_params=pltpu.CompilerParams(
                dimension_semantics=("parallel", "parallel")),
            cost_estimate=pl.CostEstimate(
                flops=5 * n, transcendentals=n,
                bytes_accessed=2 * n * item_bytes),
        )(x3)
        # Output rows are already in (radix, cardinality) order -> flatten is free.
        return out3.reshape(batch, group * rest)
    else:
        flat = x.reshape(batch, per_batch)
        bt, lt = _pick_tiles_sigmoid(batch, per_batch, item_bytes)
        grid = (pl.cdiv(batch, bt), pl.cdiv(per_batch, lt))
        n = batch * per_batch

        out = pl.pallas_call(
            _sigmoid_kernel,
            out_shape=jax.ShapeDtypeStruct((batch, per_batch), x.dtype),
            grid=grid,
            in_specs=[pl.BlockSpec((bt, lt), lambda b, l: (b, l))],
            out_specs=pl.BlockSpec((bt, lt), lambda b, l: (b, l)),
            compiler_params=pltpu.CompilerParams(
                dimension_semantics=("parallel", "parallel")),
            cost_estimate=pl.CostEstimate(
                flops=3 * n, transcendentals=n,
                bytes_accessed=2 * n * item_bytes),
        )(flat)
        return out.reshape(x.shape)


def _rsoftmax_ref(x, radix, cardinality):
    """Pure-JAX reference mirroring the PyTorch forward."""
    batch = x.shape[0]
    if radix > 1:
        xr = x.reshape(batch, cardinality, radix, -1).transpose(0, 2, 1, 3)
        xr = jax.nn.softmax(xr, axis=1)
        return xr.reshape(batch, -1)
    return jax.nn.sigmoid(x)


if __name__ == "__main__":
    key = jax.random.PRNGKey(0)
    k1, k2 = jax.random.split(key)

    radix, cardinality = 2, 4

    # 1) Typical SplAtConv2d attention input: (B, C, 1, 1), radix > 1 (rest = 8).
    batch, channels = 2, 64
    x_attn = jax.random.normal(k1, (batch, channels, 1, 1), dtype=jnp.float32)
    y = jax.block_until_ready(rsoftmax(x_attn, radix, cardinality))
    y_ref = _rsoftmax_ref(x_attn, radix, cardinality)
    assert y.shape == (batch, channels)
    assert jnp.allclose(y, y_ref, atol=1e-5, rtol=1e-5)

    # 2) Spatial feature-map input: (B, C, H, W), radix > 1 (rest = 32).
    x_sp = jax.random.normal(k2, (2, 16, 4, 4), dtype=jnp.float32)
    y_sp = jax.block_until_ready(rsoftmax(x_sp, radix, cardinality))
    y_sp_ref = _rsoftmax_ref(x_sp, radix, cardinality)
    assert y_sp.shape == (2, 16 * 4 * 4)
    assert jnp.allclose(y_sp, y_sp_ref, atol=1e-5, rtol=1e-5)

    # 3) radix == 1 path: elementwise sigmoid, shape preserved.
    y_sig = jax.block_until_ready(rsoftmax(x_attn, 1, cardinality))
    y_sig_ref = _rsoftmax_ref(x_attn, 1, cardinality)
    assert y_sig.shape == x_attn.shape
    assert jnp.allclose(y_sig, y_sig_ref, atol=1e-5, rtol=1e-5)

    print("KERNEL_OK")
</pallas_src>

<mosaic_0001>
module attributes {stable_mosaic.version = 11 : i64} {
  func.func @kernel(%arg0: i32, %arg1: i32, %arg2: memref<2x8x8xf32, #tpu.memory_space<vmem>>, %arg3: memref<2x8x8xf32, #tpu.memory_space<vmem>>) attributes {dimension_semantics = [#tpu.dimension_semantics<parallel>, #tpu.dimension_semantics<parallel>], iteration_bounds = array<i64: 1, 1>, scalar_prefetch = 0 : i64, scratch_operands = 0 : i64, tpu.core_type = #tpu.core_type<tc>, window_params = [{transform_indices = @transform_0, window_bounds = array<i64: 2, 8, 8>}, {transform_indices = @transform_1, window_bounds = array<i64: 2, 8, 8>}]} {
    %c0 = arith.constant 0 : index
    %c0_0 = arith.constant 0 : index
    %c0_1 = arith.constant 0 : index
    %0 = vector.load %arg2[%c0, %c0_0, %c0_1] : memref<2x8x8xf32, #tpu.memory_space<vmem>>, vector<2x1x8xf32>
    %1 = vector.shape_cast %0 : vector<2x1x8xf32> to vector<2x8xf32>
    %c0_2 = arith.constant 0 : index
    %c1 = arith.constant 1 : index
    %c0_3 = arith.constant 0 : index
    %2 = vector.load %arg2[%c0_2, %c1, %c0_3] : memref<2x8x8xf32, #tpu.memory_space<vmem>>, vector<2x1x8xf32>
    %3 = vector.shape_cast %2 : vector<2x1x8xf32> to vector<2x8xf32>
    %4 = arith.maximumf %1, %3 : vector<2x8xf32>
    %5 = arith.subf %1, %4 : vector<2x8xf32>
    %6 = math.exp %5 : vector<2x8xf32>
    %7 = arith.subf %3, %4 : vector<2x8xf32>
    %8 = math.exp %7 : vector<2x8xf32>
    %9 = arith.addf %6, %8 : vector<2x8xf32>
    %cst = arith.constant 1.000000e+00 : f32
    %10 = vector.broadcast %cst : f32 to vector<2x8xf32>
    %11 = arith.divf %10, %9 : vector<2x8xf32>
    %12 = arith.mulf %6, %11 : vector<2x8xf32>
    %c0_4 = arith.constant 0 : index
    %c0_5 = arith.constant 0 : index
    %c0_6 = arith.constant 0 : index
    %13 = vector.load %arg3[%c0_4, %c0_5, %c0_6] : memref<2x8x8xf32, #tpu.memory_space<vmem>>, vector<2x1x8xf32>
    %14 = vector.shape_cast %13 : vector<2x1x8xf32> to vector<2x8xf32>
    %15 = vector.shape_cast %12 : vector<2x8xf32> to vector<2x1x8xf32>
    tpu.vector_store %arg3[%c0_4, %c0_5, %c0_6], %15 {strides = array<i32>} : memref<2x8x8xf32, #tpu.memory_space<vmem>>, vector<2x1x8xf32>,
    %16 = arith.mulf %8, %11 : vector<2x8xf32>
    %c0_7 = arith.constant 0 : index
    %c4 = arith.constant 4 : index
    %c0_8 = arith.constant 0 : index
    %17 = vector.load %arg3[%c0_7, %c4, %c0_8] : memref<2x8x8xf32, #tpu.memory_space<vmem>>, vector<2x1x8xf32>
    %18 = vector.shape_cast %17 : vector<2x1x8xf32> to vector<2x8xf32>
    %19 = vector.shape_cast %16 : vector<2x8xf32> to vector<2x1x8xf32>
    tpu.vector_store %arg3[%c0_7, %c4, %c0_8], %19 {strides = array<i32>} : memref<2x8x8xf32, #tpu.memory_space<vmem>>, vector<2x1x8xf32>,
    %c0_9 = arith.constant 0 : index
    %c2 = arith.constant 2 : index
    %c0_10 = arith.constant 0 : index
    %20 = vector.load %arg2[%c0_9, %c2, %c0_10] : memref<2x8x8xf32, #tpu.memory_space<vmem>>, vector<2x1x8xf32>
    %21 = vector.shape_cast %20 : vector<2x1x8xf32> to vector<2x8xf32>
    %c0_11 = arith.constant 0 : index
    %c3 = arith.constant 3 : index
    %c0_12 = arith.constant 0 : index
    %22 = vector.load %arg2[%c0_11, %c3, %c0_12] : memref<2x8x8xf32, #tpu.memory_space<vmem>>, vector<2x1x8xf32>
    %23 = vector.shape_cast %22 : vector<2x1x8xf32> to vector<2x8xf32>
    %24 = arith.maximumf %21, %23 : vector<2x8xf32>
    %25 = arith.subf %21, %24 : vector<2x8xf32>
    %26 = math.exp %25 : vector<2x8xf32>
    %27 = arith.subf %23, %24 : vector<2x8xf32>
    %28 = math.exp %27 : vector<2x8xf32>
    %29 = arith.addf %26, %28 : vector<2x8xf32>
    %cst_13 = arith.constant 1.000000e+00 : f32
    %30 = vector.broadcast %cst_13 : f32 to vector<2x8xf32>
    %31 = arith.divf %30, %29 : vector<2x8xf32>
    %32 = arith.mulf %26, %31 : vector<2x8xf32>
    %c0_14 = arith.constant 0 : index
    %c1_15 = arith.constant 1 : index
    %c0_16 = arith.constant 0 : index
    %33 = vector.load %arg3[%c0_14, %c1_15, %c0_16] : memref<2x8x8xf32, #tpu.memory_space<vmem>>, vector<2x1x8xf32>
    %34 = vector.shape_cast %33 : vector<2x1x8xf32> to vector<2x8xf32>
    %35 = vector.shape_cast %32 : vector<2x8xf32> to vector<2x1x8xf32>
    tpu.vector_store %arg3[%c0_14, %c1_15, %c0_16], %35 {strides = array<i32>} : memref<2x8x8xf32, #tpu.memory_space<vmem>>, vector<2x1x8xf32>,
    %36 = arith.mulf %28, %31 : vector<2x8xf32>
    %c0_17 = arith.constant 0 : index
    %c5 = arith.constant 5 : index
    %c0_18 = arith.constant 0 : index
    %37 = vector.load %arg3[%c0_17, %c5, %c0_18] : memref<2x8x8xf32, #tpu.memory_space<vmem>>, vector<2x1x8xf32>
    %38 = vector.shape_cast %37 : vector<2x1x8xf32> to vector<2x8xf32>
    %39 = vector.shape_cast %36 : vector<2x8xf32> to vector<2x1x8xf32>
    tpu.vector_store %arg3[%c0_17, %c5, %c0_18], %39 {strides = array<i32>} : memref<2x8x8xf32, #tpu.memory_space<vmem>>, vector<2x1x8xf32>,
    %c0_19 = arith.constant 0 : index
    %c4_20 = arith.constant 4 : index
    %c0_21 = arith.constant 0 : index
    %40 = vector.load %arg2[%c0_19, %c4_20, %c0_21] : memref<2x8x8xf32, #tpu.memory_space<vmem>>, vector<2x1x8xf32>
    %41 = vector.shape_cast %40 : vector<2x1x8xf32> to vector<2x8xf32>
    %c0_22 = arith.constant 0 : index
    %c5_23 = arith.constant 5 : index
    %c0_24 = arith.constant 0 : index
    %42 = vector.load %arg2[%c0_22, %c5_23, %c0_24] : memref<2x8x8xf32, #tpu.memory_space<vmem>>, vector<2x1x8xf32>
    %43 = vector.shape_cast %42 : vector<2x1x8xf32> to vector<2x8xf32>
    %44 = arith.maximumf %41, %43 : vector<2x8xf32>
    %45 = arith.subf %41, %44 : vector<2x8xf32>
    %46 = math.exp %45 : vector<2x8xf32>
    %47 = arith.subf %43, %44 : vector<2x8xf32>
    %48 = math.exp %47 : vector<2x8xf32>
    %49 = arith.addf %46, %48 : vector<2x8xf32>
    %cst_25 = arith.constant 1.000000e+00 : f32
    %50 = vector.broadcast %cst_25 : f32 to vector<2x8xf32>
    %51 = arith.divf %50, %49 : vector<2x8xf32>
    %52 = arith.mulf %46, %51 : vector<2x8xf32>
    %c0_26 = arith.constant 0 : index
    %c2_27 = arith.constant 2 : index
    %c0_28 = arith.constant 0 : index
    %53 = vector.load %arg3[%c0_26, %c2_27, %c0_28] : memref<2x8x8xf32, #tpu.memory_space<vmem>>, vector<2x1x8xf32>
    %54 = vector.shape_cast %53 : vector<2x1x8xf32> to vector<2x8xf32>
    %55 = vector.shape_cast %52 : vector<2x8xf32> to vector<2x1x8xf32>
    tpu.vector_store %arg3[%c0_26, %c2_27, %c0_28], %55 {strides = array<i32>} : memref<2x8x8xf32, #tpu.memory_space<vmem>>, vector<2x1x8xf32>,
    %56 = arith.mulf %48, %51 : vector<2x8xf32>
    %c0_29 = arith.constant 0 : index
    %c6 = arith.constant 6 : index
    %c0_30 = arith.constant 0 : index
    %57 = vector.load %arg3[%c0_29, %c6, %c0_30] : memref<2x8x8xf32, #tpu.memory_space<vmem>>, vector<2x1x8xf32>
    %58 = vector.shape_cast %57 : vector<2x1x8xf32> to vector<2x8xf32>
    %59 = vector.shape_cast %56 : vector<2x8xf32> to vector<2x1x8xf32>
    tpu.vector_store %arg3[%c0_29, %c6, %c0_30], %59 {strides = array<i32>} : memref<2x8x8xf32, #tpu.memory_space<vmem>>, vector<2x1x8xf32>,
    %c0_31 = arith.constant 0 : index
    %c6_32 = arith.constant 6 : index
    %c0_33 = arith.constant 0 : index
    %60 = vector.load %arg2[%c0_31, %c6_32, %c0_33] : memref<2x8x8xf32, #tpu.memory_space<vmem>>, vector<2x1x8xf32>
    %61 = vector.shape_cast %60 : vector<2x1x8xf32> to vector<2x8xf32>
    %c0_34 = arith.constant 0 : index
    %c7 = arith.constant 7 : index
    %c0_35 = arith.constant 0 : index
    %62 = vector.load %arg2[%c0_34, %c7, %c0_35] : memref<2x8x8xf32, #tpu.memory_space<vmem>>, vector<2x1x8xf32>
    %63 = vector.shape_cast %62 : vector<2x1x8xf32> to vector<2x8xf32>
    %64 = arith.maximumf %61, %63 : vector<2x8xf32>
    %65 = arith.subf %61, %64 : vector<2x8xf32>
    %66 = math.exp %65 : vector<2x8xf32>
    %67 = arith.subf %63, %64 : vector<2x8xf32>
    %68 = math.exp %67 : vector<2x8xf32>
    %69 = arith.addf %66, %68 : vector<2x8xf32>
    %cst_36 = arith.constant 1.000000e+00 : f32
    %70 = vector.broadcast %cst_36 : f32 to vector<2x8xf32>
    %71 = arith.divf %70, %69 : vector<2x8xf32>
    %72 = arith.mulf %66, %71 : vector<2x8xf32>
    %c0_37 = arith.constant 0 : index
    %c3_38 = arith.constant 3 : index
    %c0_39 = arith.constant 0 : index
    %73 = vector.load %arg3[%c0_37, %c3_38, %c0_39] : memref<2x8x8xf32, #tpu.memory_space<vmem>>, vector<2x1x8xf32>
    %74 = vector.shape_cast %73 : vector<2x1x8xf32> to vector<2x8xf32>
    %75 = vector.shape_cast %72 : vector<2x8xf32> to vector<2x1x8xf32>
    tpu.vector_store %arg3[%c0_37, %c3_38, %c0_39], %75 {strides = array<i32>} : memref<2x8x8xf32, #tpu.memory_space<vmem>>, vector<2x1x8xf32>,
    %76 = arith.mulf %68, %71 : vector<2x8xf32>
    %c0_40 = arith.constant 0 : index
    %c7_41 = arith.constant 7 : index
    %c0_42 = arith.constant 0 : index
    %77 = vector.load %arg3[%c0_40, %c7_41, %c0_42] : memref<2x8x8xf32, #tpu.memory_space<vmem>>, vector<2x1x8xf32>
    %78 = vector.shape_cast %77 : vector<2x1x8xf32> to vector<2x8xf32>
    %79 = vector.shape_cast %76 : vector<2x8xf32> to vector<2x1x8xf32>
    tpu.vector_store %arg3[%c0_40, %c7_41, %c0_42], %79 {strides = array<i32>} : memref<2x8x8xf32, #tpu.memory_space<vmem>>, vector<2x1x8xf32>,
    return
  }
  func.func @transform_0(%arg0: i32, %arg1: i32) -> (i32, i32, i32) {
    %c0_i32 = arith.constant 0 : i32
    %c0_i32_0 = arith.constant 0 : i32
    return %arg0, %c0_i32, %arg1 : i32, i32, i32
  }
  func.func @transform_1(%arg0: i32, %arg1: i32) -> (i32, i32, i32) {
    %c0_i32 = arith.constant 0 : i32
    %c0_i32_0 = arith.constant 0 : i32
    return %arg0, %c0_i32, %arg1 : i32, i32, i32
  }
}

</mosaic_0001>

<bundles_post_ra>
// kernel: tpu_custom_call.1
= control target key start
LH: loop header
LB: loop body
LE: loop exit
PB: predicated region body
PF: predicated region fallthrough
CT: control target
= control target key end

     0   :  { %6 = vsyncpa [#allocation3], 0  ;;  %s307_s0 = inlined_call_operand.hbm [shape: f32[2,8,8], index: 0, kind: input, shape index: {}]   ;;  %s308_s1 = inlined_call_operand.hbm [shape: f32[2,8,8], index: 1, kind: output, shape index: {}]  }
   0x1   :  { %7 = vsyncpa [#allocation4], 0  ;;  %s265_s6 = smov [#allocation2]  }
   0x2   :  { %s13_s7 = sshll.u32 %s265_s6, 4  ;;  %s14_s7 = int_to_ptr.vmem [resolvable:$true] %s13_s7 }
   0x3   :  { %s229_s8 = scalar_lea.vmem %s14_s7, 256  ;;  %p234_p1 = scmp.lt.s32.totalorder %s14_s7, %s14_s7 }
   0x4   :  { %p230_p0 = scmp.ne.s32.totalorder %s14_s7, %s229_s8  ;;  %p235_p2 = scmp.lt.s32.totalorder %s229_s8, %s229_s8 }
   0x6   :  { %p236_p3 = por %p235_p2, %p234_p1 }
   0x8   :  { %p237_p4 = pnand %p236_p3, %p230_p0 }
   0xa   :  { %240 = shalt.err (!%p237_p4)
}
   0xb   :  { %s266_s9 = smov 128   ;;  %s267_s10 = smov 8  }
   0xc   :  { %19 = dma.hbm_to_vmem [thread:$0]  %s307_s0, 256, %s14_s7, [#allocation3], %s266_s9, %s266_s9, %s267_s10  }
   0xd   :  { %261 = dma.done.wait [#allocation3], 256  }
   0xe   :  { %262 = vsyncadd [#allocation3], 4294967040  ;;  %v23_v0 = vld [vmem:[#allocation2] sm:$0x1]  ;;  %v25_v1 = vld [vmem:[#allocation2 + $0x1] sm:$0x1] }
   0xf   :  { %v24_v2 = vld [vmem:[#allocation2 + $0x8] sm:$0x1]  ;;  %v27_v3 = vmax.f32 %v23_v0, %v25_v1  ;;  %v26_v4 = vld [vmem:[#allocation2 + $0x9] sm:$0x1]  ;;  %v56_v5 = vld [vmem:[#allocation2 + $0x2] sm:$0x1] }
  0x10   :  { %v58_v6 = vld [vmem:[#allocation2 + $0x3] sm:$0x1]  ;;  %v28_v7 = vmax.f32 %v24_v2, %v26_v4  ;;  %v57_v9 = vld [vmem:[#allocation2 + $0xa] sm:$0x1]  ;;  %v59_v10 = vld [vmem:[#allocation2 + $0xb] sm:$0x1] }
  0x11   :  { %v60_v8 = vmax.f32 %v56_v5, %v58_v6  ;;  %v29_v11 = vsub.f32 %v23_v0, %v27_v3  ;;  %v35_v12 = vsub.f32 %v25_v1, %v27_v3  ;;  %v61_v13 = vmax.f32 %v57_v9, %v59_v10  ;;  %v88_v14 = vld [vmem:[#allocation2 + $0x4] sm:$0x1]  ;;  %v90_v15 = vld [vmem:[#allocation2 + $0x5] sm:$0x1]  ;;  %v89_v16 = vld [vmem:[#allocation2 + $0xc] sm:$0x1] }
  0x12   :  { %v30_v17 = vsub.f32 %v24_v2, %v28_v7  ;;  %v36_v18 = vsub.f32 %v26_v4, %v28_v7  ;;  %v91_v21 = vld [vmem:[#allocation2 + $0xd] sm:$0x1]  ;;  %v120_v22 = vld [vmem:[#allocation2 + $0x6] sm:$0x1]  ;;  %v122_v23 = vld [vmem:[#allocation2 + $0x7] sm:$0x1]  ;;  %v92_v31 = vmax.f32 %v88_v14, %v90_v15 }
  0x13   :  { %v62_v19 = vsub.f32 %v56_v5, %v60_v8  ;;  %v68_v20 = vsub.f32 %v58_v6, %v60_v8  ;;  %v31_v24 = vmul.f32 1.442695, %v29_v11  ;;  %v37_v25 = vmul.f32 1.442695, %v35_v12  ;;  %v121_v27 = vld [vmem:[#allocation2 + $0xe] sm:$0x1] }
  0x14   :  { %v63_v26 = vsub.f32 %v57_v9, %v61_v13  ;;  %v33_v28 = vmul.f32 1.442695, %v30_v17  ;;  %v39_v29 = vmul.f32 1.442695, %v36_v18  ;;  %v69_v30 = vsub.f32 %v59_v10, %v61_v13  ;;  %v123_v32 = vld [vmem:[#allocation2 + $0xf] sm:$0x1] }
  0x15   :  { %173 = vpow2.f32 %v31_v24  ;;  %v64_v33 = vmul.f32 1.442695, %v62_v19  ;;  %v70_v34 = vmul.f32 1.442695, %v68_v20  ;;  %v94_v35 = vsub.f32 %v88_v14, %v92_v31  ;;  %s268_s0 = smov [#allocation5]  }
  0x16   :  { %175 = vpow2.f32 %v37_v25  ;;  %v100_v36 = vsub.f32 %v90_v15, %v92_v31  ;;  %v93_v37 = vmax.f32 %v89_v16, %v91_v21  ;;  %v66_v38 = vmul.f32 1.442695, %v63_v26  ;;  %s157_s13 = sshll.u32 %s268_s0, 4  ;;  %s158_s13 = int_to_ptr.vmem [resolvable:$true] %s157_s13 }
  0x17   :  { %177 = vpow2.f32 %v33_v28  ;;  %v124_v39 = vmax.f32 %v120_v22, %v122_v23  ;;  %v125_v40 = vmax.f32 %v121_v27, %v123_v32  ;;  %v72_v41 = vmul.f32 1.442695, %v69_v30  ;;  %s241_s14 = scalar_lea.vmem %s158_s13, 256  ;;  %p246_p6 = scmp.lt.s32.totalorder %s158_s13, %s158_s13 }
  0x18   :  { %179 = vpow2.f32 %v39_v29  ;;  %v95_v42 = vsub.f32 %v89_v16, %v93_v37  ;;  %v96_v43 = vmul.f32 1.442695, %v94_v35  ;;  %v101_v44 = vsub.f32 %v91_v21, %v93_v37  ;;  %p242_p5 = scmp.ne.s32.totalorder %s158_s13, %s241_s14  ;;  %p247_p7 = scmp.lt.s32.totalorder %s241_s14, %s241_s14 }
  0x19   :  { %181 = vpow2.f32 %v64_v33  ;;  %v126_v45 = vsub.f32 %v120_v22, %v124_v39  ;;  %v102_v46 = vmul.f32 1.442695, %v100_v36  ;;  %v132_v47 = vsub.f32 %v122_v23, %v124_v39 }
  0x1a   :  { %183 = vpow2.f32 %v70_v34  ;;  %v98_v48 = vmul.f32 1.442695, %v95_v42  ;;  %v127_v49 = vsub.f32 %v121_v27, %v125_v40  ;;  %v104_v50 = vmul.f32 1.442695, %v101_v44  ;;  %p248_p8 = por %p247_p7, %p246_p6 }
  0x1b   :  { %185 = vpow2.f32 %v66_v38  ;;  %v133_v51 = vsub.f32 %v123_v32, %v125_v40  ;;  %v128_v52 = vmul.f32 1.442695, %v126_v45  ;;  %v134_v53 = vmul.f32 1.442695, %v132_v47 }
  0x1c   :  { %187 = vpow2.f32 %v72_v41  ;;  %v130_v54 = vmul.f32 1.442695, %v127_v49  ;;  %vm49_vm0 = vcmask 57344   ;;  %p249_p9 = pnand %p248_p8, %p242_p5 }
  0x1d   :  { %189 = vpow2.f32 %v96_v43  ;;  %v136_v55 = vmul.f32 1.442695, %v133_v51 }
  0x1e   :  { %191 = vpow2.f32 %v102_v46 }
  0x1f   :  { %193 = vpow2.f32 %v98_v48 }
  0x20   :  { %195 = vpow2.f32 %v104_v50 }
  0x21   :  { %197 = vpow2.f32 %v128_v52 }
  0x22   :  { %v174_v56 = vpop.eup %173  ;;  %199 = vpow2.f32 %v134_v53 }
  0x23   :  { %v176_v57 = vpop.eup %175  ;;  %201 = vpow2.f32 %v130_v54 }
  0x24   :  { %v178_v58 = vpop.eup %177  ;;  %v41_v59 = vadd.f32 %v176_v57, %v174_v56  ;;  %203 = vpow2.f32 %v136_v55 }
  0x25   :  { %v180_v60 = vpop.eup %179 }
  0x26   :  { %v182_v61 = vpop.eup %181  ;;  %205 = vrcp.f32 %v41_v59  ;;  %v42_v62 = vadd.f32 %v180_v60, %v178_v58 }
  0x27   :  { %v184_v63 = vpop.eup %183 }
  0x28   :  { %v186_v0 = vpop.eup %185  ;;  %207 = vrcp.f32 %v42_v62  ;;  %v74_v1 = vadd.f32 %v184_v63, %v182_v61 }
  0x29   :  { %v188_v2 = vpop.eup %187 }
  0x2a   :  { %v190_v3 = vpop.eup %189  ;;  %209 = vrcp.f32 %v74_v1  ;;  %v75_v4 = vadd.f32 %v188_v2, %v186_v0 }
  0x2b   :  { %v192_v5 = vpop.eup %191 }
  0x2c   :  { %v194_v6 = vpop.eup %193  ;;  %211 = vrcp.f32 %v75_v4  ;;  %v106_v7 = vadd.f32 %v192_v5, %v190_v3 }
  0x2d   :  { %v196_v8 = vpop.eup %195 }
  0x2e   :  { %v198_v9 = vpop.eup %197  ;;  %213 = vrcp.f32 %v106_v7  ;;  %v107_v10 = vadd.f32 %v196_v8, %v194_v6 }
  0x2f   :  { %v200_v11 = vpop.eup %199 }
  0x30   :  { %v202_v12 = vpop.eup %201  ;;  %215 = vrcp.f32 %v107_v10  ;;  %v138_v13 = vadd.f32 %v200_v11, %v198_v9 }
  0x31   :  { %v204_v14 = vpop.eup %203 }
  0x32   :  { %217 = vrcp.f32 %v138_v13  ;;  %v139_v15 = vadd.f32 %v204_v14, %v202_v12 }
  0x33   :  { %v206_v16 = vpop.eup %205 }
  0x34   :  { %v47_v17 = vmul.f32 %v206_v16, %v174_v56  ;;  %v52_v18 = vmul.f32 %v206_v16, %v176_v57  ;;  %219 = vrcp.f32 %v139_v15 }
  0x35   :  { %v208_v19 = vpop.eup %207 }
  0x36   :  { %50 = vst.msk [vmem:[#allocation5] sm:$0x1] %vm49_vm0, %v47_v17  ;;  %v48_v20 = vmul.f32 %v208_v19, %v178_v58  ;;  %54 = vst.msk [vmem:[#allocation5 + $0x4] sm:$0x1] %vm49_vm0, %v52_v18  ;;  %v53_v21 = vmul.f32 %v208_v19, %v180_v60 }
  0x37   :  { %v210_v22 = vpop.eup %209 }
  0x38   :  { %51 = vst.msk [vmem:[#allocation5 + $0x8] sm:$0x1] %vm49_vm0, %v48_v20  ;;  %55 = vst.msk [vmem:[#allocation5 + $0xc] sm:$0x1] %vm49_vm0, %v53_v21  ;;  %v80_v23 = vmul.f32 %v210_v22, %v182_v61  ;;  %v84_v24 = vmul.f32 %v210_v22, %v184_v63 }
  0x39   :  { %v212_v25 = vpop.eup %211 }
  0x3a   :  { %82 = vst.msk [vmem:[#allocation5 + $0x1] sm:$0x1] %vm49_vm0, %v80_v23  ;;  %v81_v26 = vmul.f32 %v212_v25, %v186_v0  ;;  %86 = vst.msk [vmem:[#allocation5 + $0x5] sm:$0x1] %vm49_vm0, %v84_v24  ;;  %v85_v27 = vmul.f32 %v212_v25, %v188_v2 }
  0x3b   :  { %v214_v28 = vpop.eup %213 }
  0x3c   :  { %83 = vst.msk [vmem:[#allocation5 + $0x9] sm:$0x1] %vm49_vm0, %v81_v26  ;;  %87 = vst.msk [vmem:[#allocation5 + $0xd] sm:$0x1] %vm49_vm0, %v85_v27  ;;  %v112_v29 = vmul.f32 %v214_v28, %v190_v3  ;;  %v116_v30 = vmul.f32 %v214_v28, %v192_v5 }
  0x3d   :  { %v216_v31 = vpop.eup %215 }
  0x3e   :  { %114 = vst.msk [vmem:[#allocation5 + $0x2] sm:$0x1] %vm49_vm0, %v112_v29  ;;  %v113_v32 = vmul.f32 %v216_v31, %v194_v6  ;;  %118 = vst.msk [vmem:[#allocation5 + $0x6] sm:$0x1] %vm49_vm0, %v116_v30  ;;  %v117_v33 = vmul.f32 %v216_v31, %v196_v8 }
  0x3f   :  { %v218_v34 = vpop.eup %217 }
  0x40   :  { %115 = vst.msk [vmem:[#allocation5 + $0xa] sm:$0x1] %vm49_vm0, %v113_v32  ;;  %119 = vst.msk [vmem:[#allocation5 + $0xe] sm:$0x1] %vm49_vm0, %v117_v33  ;;  %v144_v35 = vmul.f32 %v218_v34, %v198_v9  ;;  %v148_v36 = vmul.f32 %v218_v34, %v200_v11 }
  0x41   :  { %v220_v37 = vpop.eup %219 }
  0x42   :  { %146 = vst.msk [vmem:[#allocation5 + $0x3] sm:$0x1] %vm49_vm0, %v144_v35  ;;  %v145_v38 = vmul.f32 %v220_v37, %v202_v12  ;;  %150 = vst.msk [vmem:[#allocation5 + $0x7] sm:$0x1] %vm49_vm0, %v148_v36  ;;  %v149_v39 = vmul.f32 %v220_v37, %v204_v14 }
  0x44   :  { %147 = vst.msk [vmem:[#allocation5 + $0xb] sm:$0x1] %vm49_vm0, %v145_v38  ;;  %151 = vst.msk [vmem:[#allocation5 + $0xf] sm:$0x1] %vm49_vm0, %v149_v39 }
  0x45   :  { %252 = shalt.err (!%p249_p9)
}
  0x46   :  { %163 = dma.vmem_to_hbm [thread:$0]  %s158_s13, 256, %s308_s1, [#allocation4], %s266_s9, %s266_s9, %s267_s10  }
  0x47   :  { %263 = dma.done.wait [#allocation4], 256  }
  0x48   :  { %264 = vsyncadd [#allocation4], 4294967040 }
  0x49   :  { %167 = vsyncpa [#allocation3], 1 }
  0x4a   :  { %168 = vsyncpa [#allocation4], 1 }

</bundles_post_ra>
